<compile_context>
chip_gen: v6e
topology: v6e:2x2x1
jax: 0.10.0
libtpu: 0.0.40
codegen_flags: <defaults>
</compile_context>

<pallas_src>
import math

import jax
import jax.numpy as jnp
from jax.experimental import pallas as pl
from jax.experimental.pallas import tpu as pltpu

# ----------------------------- configuration --------------------------------
B = 2                       # batch
S = 8                       # sequence length
D_MODEL = 32                # hidden size
HEADS = 4                   # attention heads
KV_HEADS = 2                # key/value heads (GQA)
HEAD_DIM = D_MODEL // HEADS          # 8
GROUPS = HEADS // KV_HEADS           # 2
D_FF = 4 * D_MODEL                   # 128 (lane-dense intermediate)
LN_EPS = 1e-12
ROPE_THETA = 10000.0

TOKENS = B * S                       # 16 -- batch folded into the sublane axis
Q_DIM = HEADS * HEAD_DIM             # 32
KV_DIM = KV_HEADS * HEAD_DIM         # 16
QKV_WIDTH = 5 * Q_DIM                # 160: [Q*scale | Kexp | Qrot*scale | Krot | Vexp]
MASK_NEG = -1e9                      # additive mask for cross-batch positions

# --- packed parameter slab layouts (static offsets, all float32) ------------
A_ROWS = 40      # slab A (width 160): rows 0:32 wqkv, row 32 bqkv, pad to 40
B_ROWS = 56      # slab B (width 128): rows 0:16 [cos|sin], 16:48 wi, row 48 bi
C_ROWS = 184     # slab C (width 32) : rows 0..5 small vectors, cross-mask, wo, wo2
C_CROSS = 8      # rows  8:24  cross-batch block-diag additive mask (cols 0:16)
C_WO = 24        # rows 24:56  o_proj weight (32, 32)
C_WO2 = 56       # rows 56:184 FFN output weight (128, 32)


def _gelu_tanh(x):
    # tanh approximation of GELU (used in both kernel and reference).
    c = math.sqrt(2.0 / math.pi)
    return 0.5 * x * (1.0 + jnp.tanh(c * (x + 0.044715 * (x * x * x))))


# ------------------------------- kernel -------------------------------------
def _encoder_layer_kernel(x_ref, mask_ref, wa_ref, wb_ref, wc_ref, out_ref):
    x = x_ref[...]                          # (TOKENS, D_MODEL)
    wa = wa_ref[...]                        # (A_ROWS, 160)
    wb = wb_ref[...]                        # (B_ROWS, 128)
    wc = wc_ref[...]                        # (C_ROWS, 32)

    # ---- static slices out of the packed parameter slabs
    wqkv = wa[0:D_MODEL, :]                                 # (32, 160)
    bqkv = wa[D_MODEL:D_MODEL + 1, :]                       # (1, 160)
    cos_all = wb[0:TOKENS, 0:2 * Q_DIM]                     # (16, 64)
    sin_all = wb[0:TOKENS, 2 * Q_DIM:4 * Q_DIM]             # (16, 64)
    wi = wb[TOKENS:TOKENS + D_MODEL, :]                     # (32, 128)
    bi = wb[TOKENS + D_MODEL:TOKENS + D_MODEL + 1, :]       # (1, 128)
    g1, b1 = wc[0:1, :], wc[1:2, :]
    bo = wc[2:3, :]
    g2, b2 = wc[3:4, :], wc[4:5, :]
    bo2 = wc[5:6, :]
    cross = wc[C_CROSS:C_CROSS + TOKENS, 0:TOKENS]          # (16, 16)
    wo = wc[C_WO:C_WO + D_MODEL, :]                         # (32, 32)
    wo2 = wc[C_WO2:C_WO2 + D_FF, :]                         # (128, 32)

    # ---- pre-LayerNorm (biased variance, eps inside rsqrt, like nn.LayerNorm)
    mu = jnp.mean(x, axis=-1, keepdims=True)
    var = jnp.mean((x - mu) ** 2, axis=-1, keepdims=True)
    ln = (x - mu) * jax.lax.rsqrt(var + LN_EPS) * g1 + b1

    # ---- ONE fused projection: [Q*scale | Kexp | (Q*scale)@R | Kexp@R | Vexp]
    #      (softmax scale, rotate-half R and the GQA repeat_interleave are all
    #       folded into the weight columns at init time).
    qkv = (jnp.dot(ln, wqkv, preferred_element_type=jnp.float32)
           + bqkv)                                          # (TOKENS, 160)
    qk = qkv[:, 0:2 * Q_DIM]                                # (16, 64) [Q | Kexp]
    qk_rot = qkv[:, 2 * Q_DIM:4 * Q_DIM]                    # (16, 64)
    v = qkv[:, 4 * Q_DIM:5 * Q_DIM]                         # (16, 32) per-head V

    # ---- RoPE: one purely elementwise pass over [Q | K]
    qk_r = qk * cos_all + qk_rot * sin_all                  # (16, 64)
    q_r = qk_r[:, 0:Q_DIM]                                  # (16, 32)
    k_r = qk_r[:, Q_DIM:2 * Q_DIM]                          # (16, 32)

    # ---- folded-batch additive mask: own-batch mask tiled across key blocks,
    #      cross-batch blocks killed by the precomputed block-diagonal term.
    m_own = mask_ref[...]                                   # (TOKENS, S)
    mask_f = jnp.concatenate([m_own] * B, axis=1) + cross   # (TOKENS, TOKENS)

    # ---- attention: per-head scores stacked along sublanes -> ONE softmax
    scores = []
    for h in range(HEADS):                                  # static unroll
        qh = q_r[:, h * HEAD_DIM:(h + 1) * HEAD_DIM]
        kh = k_r[:, h * HEAD_DIM:(h + 1) * HEAD_DIM]
        sh = jax.lax.dot_general(qh, kh, (((1,), (1,)), ((), ())),
                                 preferred_element_type=jnp.float32)
        scores.append(sh + mask_f)
    s = jnp.concatenate(scores, axis=0)                     # (HEADS*TOKENS, TOKENS)
    s = s - jnp.max(s, axis=-1, keepdims=True)              # one XLU reduce
    p = jnp.exp(s)                                          # one EUP pass
    p = p / jnp.sum(p, axis=-1, keepdims=True)              # one reduce + exact recip

    # ---- per-head context lane-placed into one buffer -> ONE o_proj matmul
    ctx = []
    for h in range(HEADS):
        vh = v[:, h * HEAD_DIM:(h + 1) * HEAD_DIM]
        ph = p[h * TOKENS:(h + 1) * TOKENS, :]              # cheap sublane slice
        ctx.append(jnp.dot(ph, vh, preferred_element_type=jnp.float32))
    ctx = jnp.concatenate(ctx, axis=1)                      # (TOKENS, D_MODEL)
    attn_out = ln + bo + jnp.dot(ctx, wo, preferred_element_type=jnp.float32)

    # ---- second LayerNorm + FFN (GELU, 128-lane intermediate) + residual
    mu2 = jnp.mean(attn_out, axis=-1, keepdims=True)
    var2 = jnp.mean((attn_out - mu2) ** 2, axis=-1, keepdims=True)
    ln2 = (attn_out - mu2) * jax.lax.rsqrt(var2 + LN_EPS) * g2 + b2

    inter = _gelu_tanh(
        jnp.dot(ln2, wi, preferred_element_type=jnp.float32) + bi)
    ffn = jnp.dot(inter, wo2, preferred_element_type=jnp.float32) + bo2

    out_ref[...] = (ffn + attn_out).astype(out_ref.dtype)


# ------------------------- host-side constant folding ------------------------
def _rope_tables(seq_len, dim, theta=ROPE_THETA):
    inv_freq = 1.0 / (theta ** (jnp.arange(0, dim, 2, dtype=jnp.float32) / dim))
    t = jnp.arange(seq_len, dtype=jnp.float32)
    freqs = jnp.outer(t, inv_freq)                     # (S, dim//2)
    emb = jnp.concatenate([freqs, freqs], axis=-1)     # (S, dim)
    return jnp.cos(emb), jnp.sin(emb)


def _rotate_half_matrix(dim):
    # row_vec @ P  ==  concat(-row_vec[half:], row_vec[:half])
    half = dim // 2
    p = jnp.zeros((dim, dim), jnp.float32)
    p = p.at[half:, :half].set(-jnp.eye(half, dtype=jnp.float32))
    p = p.at[:half, half:].set(jnp.eye(half, dtype=jnp.float32))
    return p


def build_kernel_params(raw):
    """One-time host-side folding & packing into 3 contiguous parameter slabs."""
    scale = 1.0 / math.sqrt(HEAD_DIM)
    p = _rotate_half_matrix(HEAD_DIM)
    r_q = jnp.kron(jnp.eye(HEADS, dtype=jnp.float32), p)       # per-head rotate-half

    def expand_kv(w):
        # fold GQA repeat_interleave (kv-head -> per-attention-head copies)
        w3 = w.reshape(w.shape[0], KV_HEADS, HEAD_DIM)
        w3 = jnp.repeat(w3, GROUPS, axis=1)
        return w3.reshape(w.shape[0], HEADS * HEAD_DIM)

    wq_s, bq_s = raw["wq_t"] * scale, raw["bq"] * scale
    wk_e, bk_e = expand_kv(raw["wk_t"]), expand_kv(raw["bk"])
    wv_e, bv_e = expand_kv(raw["wv_t"]), expand_kv(raw["bv"])

    wqkv = jnp.concatenate([wq_s, wk_e, wq_s @ r_q, wk_e @ r_q, wv_e], axis=1)
    bqkv = jnp.concatenate([bq_s, bk_e, bq_s @ r_q, bk_e @ r_q, bv_e], axis=1)

    cos, sin = _rope_tables(S, HEAD_DIM)           # position_ids = arange(S) per batch
    cos_all = jnp.tile(cos, (B, 2 * HEADS))        # (TOKENS, 64) covers [Q | Kexp]
    sin_all = jnp.tile(sin, (B, 2 * HEADS))

    # cross-batch block-diagonal additive mask (depends only on B,S -> hoisted)
    bids = jnp.arange(B)
    same = bids[:, None, None, None] == bids[None, None, :, None]     # (B,1,B,1)
    cross = jnp.where(same, 0.0, MASK_NEG)
    cross = jnp.broadcast_to(cross, (B, S, B, S)).reshape(TOKENS, TOKENS)
    cross = cross.astype(jnp.float32)

    slab_a = jnp.zeros((A_ROWS, QKV_WIDTH), jnp.float32)
    slab_a = (slab_a.at[0:D_MODEL, :].set(wqkv)
                     .at[D_MODEL:D_MODEL + 1, :].set(bqkv))

    slab_b = jnp.zeros((B_ROWS, D_FF), jnp.float32)
    slab_b = (slab_b.at[0:TOKENS, 0:2 * Q_DIM].set(cos_all)
                     .at[0:TOKENS, 2 * Q_DIM:4 * Q_DIM].set(sin_all)
                     .at[TOKENS:TOKENS + D_MODEL, :].set(raw["wi_t"])
                     .at[TOKENS + D_MODEL:TOKENS + D_MODEL + 1, :].set(raw["bi"]))

    slab_c = jnp.zeros((C_ROWS, D_MODEL), jnp.float32)
    slab_c = (slab_c.at[0:1, :].set(raw["gamma1"])
                     .at[1:2, :].set(raw["beta1"])
                     .at[2:3, :].set(raw["bo"])
                     .at[3:4, :].set(raw["gamma2"])
                     .at[4:5, :].set(raw["beta2"])
                     .at[5:6, :].set(raw["bo2"])
                     .at[C_CROSS:C_CROSS + TOKENS, 0:TOKENS].set(cross)
                     .at[C_WO:C_WO + D_MODEL, :].set(raw["wo_t"])
                     .at[C_WO2:C_WO2 + D_FF, :].set(raw["wo2_t"]))

    return {"slab_a": slab_a, "slab_b": slab_b, "slab_c": slab_c}


# ------------------------------- wrapper -------------------------------------
def _full_spec(shape):
    return pl.BlockSpec(shape, lambda i: (0,) * len(shape))


@jax.jit
def rebert_encoder_layer_forward(x, mask, kp):
    """x: (B,S,D) f32; mask: (B,1,S,S) additive f32; kp: packed kernel params."""
    x2 = x.reshape(TOKENS, D_MODEL)                         # free row-major reshape
    # (B,1,S,S) -> (B*S, S): keeps the per-query-row mask generality; free reshape.
    mask2 = mask[:, 0].astype(jnp.float32).reshape(TOKENS, S)

    operands = (x2, mask2, kp["slab_a"], kp["slab_b"], kp["slab_c"])

    out = pl.pallas_call(
        _encoder_layer_kernel,
        out_shape=jax.ShapeDtypeStruct((TOKENS, D_MODEL), jnp.float32),
        grid_spec=pltpu.PrefetchScalarGridSpec(
            num_scalar_prefetch=0,
            grid=(1,),                                      # single invocation
            in_specs=[_full_spec(op.shape) for op in operands],
            out_specs=_full_spec((TOKENS, D_MODEL)),
        ),
        compiler_params=pltpu.CompilerParams(
            # v7x: the 2nd TensorCore is idle at this toy size; at real sizes
            # add a parallel batch/seq grid axis instead of grid=(1,).
            dimension_semantics=("arbitrary",)),
    )(*operands)
    return out.reshape(B, S, D_MODEL)


# --------------------------- pure-JAX reference ------------------------------
def _rotate_half(z):
    half = z.shape[-1] // 2
    return jnp.concatenate([-z[..., half:], z[..., :half]], axis=-1)


def encoder_layer_reference(x, mask, raw):
    """Pure-JAX port of ReBertEncoderLayer.forward (eval mode, position_ids=arange)."""
    mu = jnp.mean(x, axis=-1, keepdims=True)
    var = jnp.mean((x - mu) ** 2, axis=-1, keepdims=True)
    ln = (x - mu) / jnp.sqrt(var + LN_EPS) * raw["gamma1"][0] + raw["beta1"][0]

    q = ln @ raw["wq_t"] + raw["bq"][0]
    k = ln @ raw["wk_t"] + raw["bk"][0]
    v = ln @ raw["wv_t"] + raw["bv"][0]
    q = q.reshape(B, S, HEADS, HEAD_DIM).transpose(0, 2, 1, 3)
    k = k.reshape(B, S, KV_HEADS, HEAD_DIM).transpose(0, 2, 1, 3)
    v = v.reshape(B, S, KV_HEADS, HEAD_DIM).transpose(0, 2, 1, 3)

    cos, sin = _rope_tables(S, HEAD_DIM)
    cos, sin = cos[None, None], sin[None, None]        # (1,1,S,Dh)
    q = q * cos + _rotate_half(q) * sin
    k = k * cos + _rotate_half(k) * sin

    k = jnp.repeat(k, GROUPS, axis=1)
    v = jnp.repeat(v, GROUPS, axis=1)
    scores = jnp.einsum("bhqd,bhkd->bhqk", q, k) / math.sqrt(HEAD_DIM) + mask
    probs = jax.nn.softmax(scores.astype(jnp.float32), axis=-1)
    ctx = jnp.einsum("bhqk,bhkd->bhqd", probs, v)
    combined = ctx.transpose(0, 2, 1, 3).reshape(B, S, D_MODEL)
    attn_out = combined @ raw["wo_t"] + raw["bo"][0] + ln   # residual with normed seq

    mu2 = jnp.mean(attn_out, axis=-1, keepdims=True)
    var2 = jnp.mean((attn_out - mu2) ** 2, axis=-1, keepdims=True)
    ln2 = (attn_out - mu2) / jnp.sqrt(var2 + LN_EPS) * raw["gamma2"][0] + raw["beta2"][0]
    inter = _gelu_tanh(ln2 @ raw["wi_t"] + raw["bi"][0])
    ffn = inter @ raw["wo2_t"] + raw["bo2"][0]
    return ffn + attn_out


# --------------------------------- main --------------------------------------
if __name__ == "__main__":
    key = jax.random.PRNGKey(0)
    ks = jax.random.split(key, 17)

    def init(k, shape, scale=0.05):
        return scale * jax.random.normal(k, shape, dtype=jnp.float32)

    raw = {
        "gamma1": 1.0 + init(ks[0], (1, D_MODEL), 0.01),
        "beta1":  init(ks[1], (1, D_MODEL), 0.01),
        "wq_t":   init(ks[2], (D_MODEL, Q_DIM)),
        "bq":     init(ks[3], (1, Q_DIM)),
        "wk_t":   init(ks[4], (D_MODEL, KV_DIM)),
        "bk":     init(ks[5], (1, KV_DIM)),
        "wv_t":   init(ks[6], (D_MODEL, KV_DIM)),
        "bv":     init(ks[7], (1, KV_DIM)),
        "wo_t":   init(ks[8], (D_MODEL, D_MODEL)),
        "bo":     init(ks[9], (1, D_MODEL)),
        "gamma2": 1.0 + init(ks[10], (1, D_MODEL), 0.01),
        "beta2":  init(ks[11], (1, D_MODEL), 0.01),
        "wi_t":   init(ks[12], (D_MODEL, D_FF)),
        "bi":     init(ks[13], (1, D_FF)),
        "wo2_t":  init(ks[14], (D_FF, D_MODEL)),
        "bo2":    init(ks[15], (1, D_MODEL)),
    }
    kparams = build_kernel_params(raw)

    x = jax.random.normal(ks[16], (B, S, D_MODEL), dtype=jnp.float32)

    # Padding-style additive mask: batch 0 attends to all keys, batch 1 has its
    # last 2 key positions masked out.
    key_valid = jnp.arange(S)[None, :] < jnp.array([S, S - 2])[:, None]   # (B,S)
    mask = jnp.where(key_valid, 0.0, MASK_NEG).astype(jnp.float32)
    mask = jnp.broadcast_to(mask[:, None, None, :], (B, 1, S, S))

    out = rebert_encoder_layer_forward(x, mask, kparams)
    out = jax.block_until_ready(out)

    ref = encoder_layer_reference(x, mask, raw)
    assert out.shape == (B, S, D_MODEL)
    max_err = jnp.max(jnp.abs(out - ref))
    assert jnp.allclose(out, ref, atol=2e-4, rtol=2e-4), f"max abs err {max_err}"

    print("KERNEL_OK")
</pallas_src>

<mosaic_0001>
module attributes {stable_mosaic.version = 11 : i64} {
  func.func @_encoder_layer_kernel(%arg0: i32, %arg1: memref<16x32xf32, #tpu.memory_space<vmem>>, %arg2: memref<16x8xf32, #tpu.memory_space<vmem>>, %arg3: memref<40x160xf32, #tpu.memory_space<vmem>>, %arg4: memref<56x128xf32, #tpu.memory_space<vmem>>, %arg5: memref<184x32xf32, #tpu.memory_space<vmem>>, %arg6: memref<16x32xf32, #tpu.memory_space<vmem>>) attributes {dimension_semantics = [#tpu.dimension_semantics<arbitrary>], iteration_bounds = array<i64: 1>, scalar_prefetch = 0 : i64, scratch_operands = 0 : i64, tpu.core_type = #tpu.core_type<tc>, window_params = [{pipeline_mode = #tpu.pipeline_mode<synchronous>, transform_indices = @transform_0, window_bounds = array<i64: 16, 32>}, {pipeline_mode = #tpu.pipeline_mode<synchronous>, transform_indices = @transform_1, window_bounds = array<i64: 16, 8>}, {pipeline_mode = #tpu.pipeline_mode<synchronous>, transform_indices = @transform_2, window_bounds = array<i64: 40, 160>}, {pipeline_mode = #tpu.pipeline_mode<synchronous>, transform_indices = @transform_3, window_bounds = array<i64: 56, 128>}, {pipeline_mode = #tpu.pipeline_mode<synchronous>, transform_indices = @transform_4, window_bounds = array<i64: 184, 32>}, {pipeline_mode = #tpu.pipeline_mode<synchronous>, transform_indices = @transform_5, window_bounds = array<i64: 16, 32>}]} {
    %c0 = arith.constant 0 : index
    %c0_0 = arith.constant 0 : index
    %0 = vector.load %arg1[%c0, %c0_0] : memref<16x32xf32, #tpu.memory_space<vmem>>, vector<16x32xf32>
    %c0_1 = arith.constant 0 : index
    %c0_2 = arith.constant 0 : index
    %1 = vector.load %arg3[%c0_1, %c0_2] : memref<40x160xf32, #tpu.memory_space<vmem>>, vector<40x160xf32>
    %c0_3 = arith.constant 0 : index
    %c0_4 = arith.constant 0 : index
    %2 = vector.load %arg4[%c0_3, %c0_4] : memref<56x128xf32, #tpu.memory_space<vmem>>, vector<56x128xf32>
    %c0_5 = arith.constant 0 : index
    %c0_6 = arith.constant 0 : index
    %3 = vector.load %arg5[%c0_5, %c0_6] : memref<184x32xf32, #tpu.memory_space<vmem>>, vector<184x32xf32>
    %4 = vector.extract_strided_slice %1 {offsets = [0, 0], sizes = [32, 160], strides = [1, 1]} : vector<40x160xf32> to vector<32x160xf32>
    %5 = vector.extract_strided_slice %1 {offsets = [32, 0], sizes = [1, 160], strides = [1, 1]} : vector<40x160xf32> to vector<1x160xf32>
    %6 = vector.extract_strided_slice %2 {offsets = [0, 0], sizes = [16, 64], strides = [1, 1]} : vector<56x128xf32> to vector<16x64xf32>
    %7 = vector.extract_strided_slice %2 {offsets = [0, 64], sizes = [16, 64], strides = [1, 1]} : vector<56x128xf32> to vector<16x64xf32>
    %8 = vector.extract_strided_slice %2 {offsets = [16, 0], sizes = [32, 128], strides = [1, 1]} : vector<56x128xf32> to vector<32x128xf32>
    %9 = vector.extract_strided_slice %2 {offsets = [48, 0], sizes = [1, 128], strides = [1, 1]} : vector<56x128xf32> to vector<1x128xf32>
    %10 = vector.extract_strided_slice %3 {offsets = [0, 0], sizes = [1, 32], strides = [1, 1]} : vector<184x32xf32> to vector<1x32xf32>
    %11 = vector.extract_strided_slice %3 {offsets = [1, 0], sizes = [1, 32], strides = [1, 1]} : vector<184x32xf32> to vector<1x32xf32>
    %12 = vector.extract_strided_slice %3 {offsets = [2, 0], sizes = [1, 32], strides = [1, 1]} : vector<184x32xf32> to vector<1x32xf32>
    %13 = vector.extract_strided_slice %3 {offsets = [3, 0], sizes = [1, 32], strides = [1, 1]} : vector<184x32xf32> to vector<1x32xf32>
    %14 = vector.extract_strided_slice %3 {offsets = [4, 0], sizes = [1, 32], strides = [1, 1]} : vector<184x32xf32> to vector<1x32xf32>
    %15 = vector.extract_strided_slice %3 {offsets = [5, 0], sizes = [1, 32], strides = [1, 1]} : vector<184x32xf32> to vector<1x32xf32>
    %16 = vector.extract_strided_slice %3 {offsets = [8, 0], sizes = [16, 16], strides = [1, 1]} : vector<184x32xf32> to vector<16x16xf32>
    %17 = vector.extract_strided_slice %3 {offsets = [24, 0], sizes = [32, 32], strides = [1, 1]} : vector<184x32xf32> to vector<32x32xf32>
    %18 = vector.extract_strided_slice %3 {offsets = [56, 0], sizes = [128, 32], strides = [1, 1]} : vector<184x32xf32> to vector<128x32xf32>
    %cst = arith.constant dense<0.000000e+00> : vector<16xf32>
    %19 = vector.multi_reduction <add>, %0, %cst [1] : vector<16x32xf32> to vector<16xf32>
    %20 = vector.shape_cast %19 : vector<16xf32> to vector<16x1xf32>
    %cst_7 = arith.constant 3.200000e+01 : f32
    %21 = vector.broadcast %cst_7 : f32 to vector<16x1xf32>
    %22 = arith.divf %20, %21 : vector<16x1xf32>
    %23 = vector.broadcast %22 : vector<16x1xf32> to vector<16x32xf32>
    %24 = arith.subf %0, %23 : vector<16x32xf32>
    %25 = arith.mulf %24, %24 : vector<16x32xf32>
    %cst_8 = arith.constant dense<0.000000e+00> : vector<16xf32>
    %26 = vector.multi_reduction <add>, %25, %cst_8 [1] : vector<16x32xf32> to vector<16xf32>
    %27 = vector.shape_cast %26 : vector<16xf32> to vector<16x1xf32>
    %cst_9 = arith.constant 3.200000e+01 : f32
    %28 = vector.broadcast %cst_9 : f32 to vector<16x1xf32>
    %29 = arith.divf %27, %28 : vector<16x1xf32>
    %30 = vector.broadcast %22 : vector<16x1xf32> to vector<16x32xf32>
    %31 = arith.subf %0, %30 : vector<16x32xf32>
    %cst_10 = arith.constant 9.99999996E-13 : f32
    %32 = vector.broadcast %cst_10 : f32 to vector<16x1xf32>
    %33 = arith.addf %29, %32 : vector<16x1xf32>
    %34 = math.rsqrt %33 : vector<16x1xf32>
    %35 = vector.broadcast %34 : vector<16x1xf32> to vector<16x32xf32>
    %36 = arith.mulf %31, %35 : vector<16x32xf32>
    %37 = vector.broadcast %10 : vector<1x32xf32> to vector<16x32xf32>
    %38 = arith.mulf %36, %37 : vector<16x32xf32>
    %39 = vector.broadcast %11 : vector<1x32xf32> to vector<16x32xf32>
    %40 = arith.addf %38, %39 : vector<16x32xf32>
    %cst_11 = arith.constant dense<0.000000e+00> : vector<16x160xf32>
    %41 = tpu.matmul %40, %4, %cst_11 {dimension_numbers = #tpu.dot_dimension_numbers<[1], [0], [0], [1], [0, 0, 1, 1], [], []>} : vector<16x32xf32>, vector<32x160xf32>, vector<16x160xf32> -> vector<16x160xf32>
    %42 = vector.broadcast %5 : vector<1x160xf32> to vector<16x160xf32>
    %43 = arith.addf %41, %42 : vector<16x160xf32>
    %44 = vector.extract_strided_slice %43 {offsets = [0, 0], sizes = [16, 64], strides = [1, 1]} : vector<16x160xf32> to vector<16x64xf32>
    %45 = vector.extract_strided_slice %43 {offsets = [0, 64], sizes = [16, 64], strides = [1, 1]} : vector<16x160xf32> to vector<16x64xf32>
    %46 = vector.extract_strided_slice %43 {offsets = [0, 128], sizes = [16, 32], strides = [1, 1]} : vector<16x160xf32> to vector<16x32xf32>
    %47 = arith.mulf %44, %6 : vector<16x64xf32>
    %48 = arith.mulf %45, %7 : vector<16x64xf32>
    %49 = arith.addf %47, %48 : vector<16x64xf32>
    %50 = vector.extract_strided_slice %49 {offsets = [0, 0], sizes = [16, 32], strides = [1, 1]} : vector<16x64xf32> to vector<16x32xf32>
    %51 = vector.extract_strided_slice %49 {offsets = [0, 32], sizes = [16, 32], strides = [1, 1]} : vector<16x64xf32> to vector<16x32xf32>
    %c0_12 = arith.constant 0 : index
    %c0_13 = arith.constant 0 : index
    %52 = vector.load %arg2[%c0_12, %c0_13] : memref<16x8xf32, #tpu.memory_space<vmem>>, vector<16x8xf32>
    %53 = tpu.concatenate %52, %52 in 1 : vector<16x8xf32>, vector<16x8xf32> -> vector<16x16xf32>
    %54 = arith.addf %53, %16 : vector<16x16xf32>
    %55 = vector.extract_strided_slice %50 {offsets = [0, 0], sizes = [16, 8], strides = [1, 1]} : vector<16x32xf32> to vector<16x8xf32>
    %56 = vector.extract_strided_slice %51 {offsets = [0, 0], sizes = [16, 8], strides = [1, 1]} : vector<16x32xf32> to vector<16x8xf32>
    %cst_14 = arith.constant dense<0.000000e+00> : vector<16x16xf32>
    %57 = tpu.matmul %55, %56, %cst_14 {dimension_numbers = #tpu.dot_dimension_numbers<[1], [1], [0], [0], [0, 0, 1, 0], [], []>} : vector<16x8xf32>, vector<16x8xf32>, vector<16x16xf32> -> vector<16x16xf32>
    %58 = arith.addf %57, %54 : vector<16x16xf32>
    %59 = vector.extract_strided_slice %50 {offsets = [0, 8], sizes = [16, 8], strides = [1, 1]} : vector<16x32xf32> to vector<16x8xf32>
    %60 = vector.extract_strided_slice %51 {offsets = [0, 8], sizes = [16, 8], strides = [1, 1]} : vector<16x32xf32> to vector<16x8xf32>
    %cst_15 = arith.constant dense<0.000000e+00> : vector<16x16xf32>
    %61 = tpu.matmul %59, %60, %cst_15 {dimension_numbers = #tpu.dot_dimension_numbers<[1], [1], [0], [0], [0, 0, 1, 0], [], []>} : vector<16x8xf32>, vector<16x8xf32>, vector<16x16xf32> -> vector<16x16xf32>
    %62 = arith.addf %61, %54 : vector<16x16xf32>
    %63 = vector.extract_strided_slice %50 {offsets = [0, 16], sizes = [16, 8], strides = [1, 1]} : vector<16x32xf32> to vector<16x8xf32>
    %64 = vector.extract_strided_slice %51 {offsets = [0, 16], sizes = [16, 8], strides = [1, 1]} : vector<16x32xf32> to vector<16x8xf32>
    %cst_16 = arith.constant dense<0.000000e+00> : vector<16x16xf32>
    %65 = tpu.matmul %63, %64, %cst_16 {dimension_numbers = #tpu.dot_dimension_numbers<[1], [1], [0], [0], [0, 0, 1, 0], [], []>} : vector<16x8xf32>, vector<16x8xf32>, vector<16x16xf32> -> vector<16x16xf32>
    %66 = arith.addf %65, %54 : vector<16x16xf32>
    %67 = vector.extract_strided_slice %50 {offsets = [0, 24], sizes = [16, 8], strides = [1, 1]} : vector<16x32xf32> to vector<16x8xf32>
    %68 = vector.extract_strided_slice %51 {offsets = [0, 24], sizes = [16, 8], strides = [1, 1]} : vector<16x32xf32> to vector<16x8xf32>
    %cst_17 = arith.constant dense<0.000000e+00> : vector<16x16xf32>
    %69 = tpu.matmul %67, %68, %cst_17 {dimension_numbers = #tpu.dot_dimension_numbers<[1], [1], [0], [0], [0, 0, 1, 0], [], []>} : vector<16x8xf32>, vector<16x8xf32>, vector<16x16xf32> -> vector<16x16xf32>
    %70 = arith.addf %69, %54 : vector<16x16xf32>
    %71 = tpu.concatenate %58, %62, %66, %70 in 0 : vector<16x16xf32>, vector<16x16xf32>, vector<16x16xf32>, vector<16x16xf32> -> vector<64x16xf32>
    %cst_18 = arith.constant dense<0xFF800000> : vector<64xf32>
    %72 = vector.multi_reduction <maximumf>, %71, %cst_18 [1] : vector<64x16xf32> to vector<64xf32>
    %73 = vector.shape_cast %72 : vector<64xf32> to vector<64x1xf32>
    %74 = vector.broadcast %73 : vector<64x1xf32> to vector<64x16xf32>
    %75 = arith.subf %71, %74 : vector<64x16xf32>
    %76 = math.exp %75 : vector<64x16xf32>
    %cst_19 = arith.constant dense<0.000000e+00> : vector<64xf32>
    %77 = vector.multi_reduction <add>, %76, %cst_19 [1] : vector<64x16xf32> to vector<64xf32>
    %78 = vector.shape_cast %77 : vector<64xf32> to vector<64x1xf32>
    %79 = vector.broadcast %78 : vector<64x1xf32> to vector<64x16xf32>
    %80 = arith.divf %76, %79 : vector<64x16xf32>
    %81 = vector.extract_strided_slice %46 {offsets = [0, 0], sizes = [16, 8], strides = [1, 1]} : vector<16x32xf32> to vector<16x8xf32>
    %82 = vector.extract_strided_slice %80 {offsets = [0, 0], sizes = [16, 16], strides = [1, 1]} : vector<64x16xf32> to vector<16x16xf32>
    %cst_20 = arith.constant dense<0.000000e+00> : vector<16x8xf32>
    %83 = tpu.matmul %82, %81, %cst_20 {dimension_numbers = #tpu.dot_dimension_numbers<[1], [0], [0], [1], [0, 0, 1, 1], [], []>} : vector<16x16xf32>, vector<16x8xf32>, vector<16x8xf32> -> vector<16x8xf32>
    %84 = vector.extract_strided_slice %46 {offsets = [0, 8], sizes = [16, 8], strides = [1, 1]} : vector<16x32xf32> to vector<16x8xf32>
    %85 = vector.extract_strided_slice %80 {offsets = [16, 0], sizes = [16, 16], strides = [1, 1]} : vector<64x16xf32> to vector<16x16xf32>
    %cst_21 = arith.constant dense<0.000000e+00> : vector<16x8xf32>
    %86 = tpu.matmul %85, %84, %cst_21 {dimension_numbers = #tpu.dot_dimension_numbers<[1], [0], [0], [1], [0, 0, 1, 1], [], []>} : vector<16x16xf32>, vector<16x8xf32>, vector<16x8xf32> -> vector<16x8xf32>
    %87 = vector.extract_strided_slice %46 {offsets = [0, 16], sizes = [16, 8], strides = [1, 1]} : vector<16x32xf32> to vector<16x8xf32>
    %88 = vector.extract_strided_slice %80 {offsets = [32, 0], sizes = [16, 16], strides = [1, 1]} : vector<64x16xf32> to vector<16x16xf32>
    %cst_22 = arith.constant dense<0.000000e+00> : vector<16x8xf32>
    %89 = tpu.matmul %88, %87, %cst_22 {dimension_numbers = #tpu.dot_dimension_numbers<[1], [0], [0], [1], [0, 0, 1, 1], [], []>} : vector<16x16xf32>, vector<16x8xf32>, vector<16x8xf32> -> vector<16x8xf32>
    %90 = vector.extract_strided_slice %46 {offsets = [0, 24], sizes = [16, 8], strides = [1, 1]} : vector<16x32xf32> to vector<16x8xf32>
    %91 = vector.extract_strided_slice %80 {offsets = [48, 0], sizes = [16, 16], strides = [1, 1]} : vector<64x16xf32> to vector<16x16xf32>
    %cst_23 = arith.constant dense<0.000000e+00> : vector<16x8xf32>
    %92 = tpu.matmul %91, %90, %cst_23 {dimension_numbers = #tpu.dot_dimension_numbers<[1], [0], [0], [1], [0, 0, 1, 1], [], []>} : vector<16x16xf32>, vector<16x8xf32>, vector<16x8xf32> -> vector<16x8xf32>
    %93 = tpu.concatenate %83, %86, %89, %92 in 1 : vector<16x8xf32>, vector<16x8xf32>, vector<16x8xf32>, vector<16x8xf32> -> vector<16x32xf32>
    %94 = vector.broadcast %12 : vector<1x32xf32> to vector<16x32xf32>
    %95 = arith.addf %40, %94 : vector<16x32xf32>
    %cst_24 = arith.constant dense<0.000000e+00> : vector<16x32xf32>
    %96 = tpu.matmul %93, %17, %cst_24 {dimension_numbers = #tpu.dot_dimension_numbers<[1], [0], [0], [1], [0, 0, 1, 1], [], []>} : vector<16x32xf32>, vector<32x32xf32>, vector<16x32xf32> -> vector<16x32xf32>
    %97 = arith.addf %95, %96 : vector<16x32xf32>
    %cst_25 = arith.constant dense<0.000000e+00> : vector<16xf32>
    %98 = vector.multi_reduction <add>, %97, %cst_25 [1] : vector<16x32xf32> to vector<16xf32>
    %99 = vector.shape_cast %98 : vector<16xf32> to vector<16x1xf32>
    %cst_26 = arith.constant 3.200000e+01 : f32
    %100 = vector.broadcast %cst_26 : f32 to vector<16x1xf32>
    %101 = arith.divf %99, %100 : vector<16x1xf32>
    %102 = vector.broadcast %101 : vector<16x1xf32> to vector<16x32xf32>
    %103 = arith.subf %97, %102 : vector<16x32xf32>
    %104 = arith.mulf %103, %103 : vector<16x32xf32>
    %cst_27 = arith.constant dense<0.000000e+00> : vector<16xf32>
    %105 = vector.multi_reduction <add>, %104, %cst_27 [1] : vector<16x32xf32> to vector<16xf32>
    %106 = vector.shape_cast %105 : vector<16xf32> to vector<16x1xf32>
    %cst_28 = arith.constant 3.200000e+01 : f32
    %107 = vector.broadcast %cst_28 : f32 to vector<16x1xf32>
    %108 = arith.divf %106, %107 : vector<16x1xf32>
    %109 = vector.broadcast %101 : vector<16x1xf32> to vector<16x32xf32>
    %110 = arith.subf %97, %109 : vector<16x32xf32>
    %cst_29 = arith.constant 9.99999996E-13 : f32
    %111 = vector.broadcast %cst_29 : f32 to vector<16x1xf32>
    %112 = arith.addf %108, %111 : vector<16x1xf32>
    %113 = math.rsqrt %112 : vector<16x1xf32>
    %114 = vector.broadcast %113 : vector<16x1xf32> to vector<16x32xf32>
    %115 = arith.mulf %110, %114 : vector<16x32xf32>
    %116 = vector.broadcast %13 : vector<1x32xf32> to vector<16x32xf32>
    %117 = arith.mulf %115, %116 : vector<16x32xf32>
    %118 = vector.broadcast %14 : vector<1x32xf32> to vector<16x32xf32>
    %119 = arith.addf %117, %118 : vector<16x32xf32>
    %cst_30 = arith.constant dense<0.000000e+00> : vector<16x128xf32>
    %120 = tpu.matmul %119, %8, %cst_30 {dimension_numbers = #tpu.dot_dimension_numbers<[1], [0], [0], [1], [0, 0, 1, 1], [], []>} : vector<16x32xf32>, vector<32x128xf32>, vector<16x128xf32> -> vector<16x128xf32>
    %121 = vector.broadcast %9 : vector<1x128xf32> to vector<16x128xf32>
    %122 = arith.addf %120, %121 : vector<16x128xf32>
    %cst_31 = arith.constant 5.000000e-01 : f32
    %123 = vector.broadcast %cst_31 : f32 to vector<16x128xf32>
    %124 = arith.mulf %123, %122 : vector<16x128xf32>
    %125 = arith.mulf %122, %122 : vector<16x128xf32>
    %126 = arith.mulf %125, %122 : vector<16x128xf32>
    %cst_32 = arith.constant 4.471500e-02 : f32
    %127 = vector.broadcast %cst_32 : f32 to vector<16x128xf32>
    %128 = arith.mulf %127, %126 : vector<16x128xf32>
    %129 = arith.addf %122, %128 : vector<16x128xf32>
    %cst_33 = arith.constant 0.797884583 : f32
    %130 = vector.broadcast %cst_33 : f32 to vector<16x128xf32>
    %131 = arith.mulf %130, %129 : vector<16x128xf32>
    %132 = math.tanh %131 : vector<16x128xf32>
    %cst_34 = arith.constant 1.000000e+00 : f32
    %133 = vector.broadcast %cst_34 : f32 to vector<16x128xf32>
    %134 = arith.addf %133, %132 : vector<16x128xf32>
    %135 = arith.mulf %124, %134 : vector<16x128xf32>
    %cst_35 = arith.constant dense<0.000000e+00> : vector<16x32xf32>
    %136 = tpu.matmul %135, %18, %cst_35 {dimension_numbers = #tpu.dot_dimension_numbers<[1], [0], [0], [1], [0, 0, 1, 1], [], []>} : vector<16x128xf32>, vector<128x32xf32>, vector<16x32xf32> -> vector<16x32xf32>
    %137 = vector.broadcast %15 : vector<1x32xf32> to vector<16x32xf32>
    %138 = arith.addf %136, %137 : vector<16x32xf32>
    %139 = arith.addf %138, %97 : vector<16x32xf32>
    %c0_36 = arith.constant 0 : index
    %c0_37 = arith.constant 0 : index
    %140 = vector.load %arg6[%c0_36, %c0_37] : memref<16x32xf32, #tpu.memory_space<vmem>>, vector<16x32xf32>
    tpu.vector_store %arg6[%c0_36, %c0_37], %139 {strides = array<i32>} : memref<16x32xf32, #tpu.memory_space<vmem>>, vector<16x32xf32>,
    return
  }
  func.func @transform_0(%arg0: i32) -> (i32, i32) {
    %c0_i32 = arith.constant 0 : i32
    %c0_i32_0 = arith.constant 0 : i32
    %c0_i32_1 = arith.constant 0 : i32
    return %c0_i32, %c0_i32_0 : i32, i32
  }
  func.func @transform_1(%arg0: i32) -> (i32, i32) {
    %c0_i32 = arith.constant 0 : i32
    %c0_i32_0 = arith.constant 0 : i32
    %c0_i32_1 = arith.constant 0 : i32
    return %c0_i32, %c0_i32_0 : i32, i32
  }
  func.func @transform_2(%arg0: i32) -> (i32, i32) {
    %c0_i32 = arith.constant 0 : i32
    %c0_i32_0 = arith.constant 0 : i32
    %c0_i32_1 = arith.constant 0 : i32
    return %c0_i32, %c0_i32_0 : i32, i32
  }
  func.func @transform_3(%arg0: i32) -> (i32, i32) {
    %c0_i32 = arith.constant 0 : i32
    %c0_i32_0 = arith.constant 0 : i32
    %c0_i32_1 = arith.constant 0 : i32
    return %c0_i32, %c0_i32_0 : i32, i32
  }
  func.func @transform_4(%arg0: i32) -> (i32, i32) {
    %c0_i32 = arith.constant 0 : i32
    %c0_i32_0 = arith.constant 0 : i32
    %c0_i32_1 = arith.constant 0 : i32
    return %c0_i32, %c0_i32_0 : i32, i32
  }
  func.func @transform_5(%arg0: i32) -> (i32, i32) {
    %c0_i32 = arith.constant 0 : i32
    %c0_i32_0 = arith.constant 0 : i32
    %c0_i32_1 = arith.constant 0 : i32
    return %c0_i32, %c0_i32_0 : i32, i32
  }
}

</mosaic_0001>

<bundles_post_ra>
// kernel: rebert_encoder_layer_forward.1
= control target key start
LH: loop header
LB: loop body
LE: loop exit
PB: predicated region body
PF: predicated region fallthrough
CT: control target
= control target key end

     0   :  { %vm63_vm0 = vcmask 261120   ;;  %s1981_s0 = inlined_call_operand.vmem [shape: f32[16,32], index: 0, kind: input, shape index: {}]   ;;  %s1982_s1 = inlined_call_operand.vmem [shape: f32[16,8], index: 1, kind: input, shape index: {}]   ;;  %s1983_s2 = inlined_call_operand.vmem [shape: f32[40,160], index: 2, kind: input, shape index: {}]   ;;  %s1984_s3 = inlined_call_operand.vmem [shape: f32[56,128], index: 3, kind: input, shape index: {}]   ;;  %s1985_s4 = inlined_call_operand.vmem [shape: f32[184,32], index: 4, kind: input, shape index: {}]   ;;  %s1986_s5 = inlined_call_operand.hbm [shape: f32[16,32], index: 5, kind: output, shape index: {}]  }
   0x1   :  { %v21_v0 = vld [vmem:[%s1981_s0] sm:$0xff]  ;;  %v22_v1 = vld [vmem:[%s1981_s0 + $0x8] sm:$0xff] }
   0x2   :  { %10 = vsyncpa [#allocation3], 0  ;;  %v64_v2 = vsel %vm63_vm0, %v21_v0, 0.0  ;;  %v67_v3 = vsel %vm63_vm0, %v22_v1, 0.0  ;;  %v30_v14 = vld [vmem:[%s1983_s2 + $0x38] sm:$0xff]  ;;  %v29_v15 = vld [vmem:[%s1983_s2 + $0x30] sm:$0xff]  ;;  %v91_v28 = vlaneseq }
   0x3   :  { %65 = vadd.xlane.f32.xlu0 %v64_v2  ;;  %v28_v16 = vld [vmem:[%s1983_s2 + $0x28] sm:$0xff]  ;;  %141 = vmatprep.subr.mxu1 %v30_v14  ;;  %v27_v17 = vld [vmem:[%s1983_s2 + $0x20] sm:$0xff]  ;;  %v1661_v18 = vmov 0.0   ;;  %v26_v19 = vld [vmem:[%s1983_s2 + $0x18] sm:$0xff]  ;;  %s1662_s20 = smov 64   ;;  %vm216_vm1 = vcmask 64512  }
   0x4   :  { %181 = vmatprep.mubr.f32.mxu1 %v1661_v18  ;;  %142 = vmatpush1.msra.mxu1 %v29_v15  ;;  %v25_v20 = vld [vmem:[%s1983_s2 + $0x10] sm:$0xff]  ;;  %v24_v21 = vld [vmem:[%s1983_s2 + $0x8] sm:$0xff]  ;;  %v23_v22 = vld [vmem:[%s1983_s2] sm:$0xff]  ;;  %v1739_v30 = vshrl.u32 %v91_v28, 7  ;;  %s1663_s21 = smov 120   ;;  %s1664_s0 = smov 96  }
   0x5   :  { %143 = vmatprep.subr.mxu1 %v28_v16  ;;  %v1747_v32 = vld [vmem:[%s1985_s4] sm:$0xff]  ;;  %v34_v51 = vld [vmem:[%s1984_s3 + $0x8] sm:$0xff]  ;;  %s1665_s22 = smov 88   ;;  %s1666_s23 = smov 80   ;;  %vm583_vm2 = vcmask 130048   ;;  %vm1044_vm3 = vcmask 195584  }
   0x6   :  { %144 = vmatpush1.msra.mxu1 %v27_v17  ;;  %v1742_v31 = vsub.s32 0, %v1739_v30  ;;  %v99_v33 = vsub.s32 1, %v1739_v30  ;;  %v31_v44 = vld [vmem:[%s1983_s2 + $0x40] sm:$0xff]  ;;  %s1667_s24 = smov 112   ;;  %s1668_s25 = smov 72   ;;  %v207_v60 = vld [vmem:[%s1982_s1 + $0x8] sm:$0xff] }
   0x7   :  { %68 = vadd.xlane.f32.xlu0 %v67_v3  ;;  %145 = vmatprep.subr.mxu1 %v26_v19  ;;  %v33_v46 = vld [vmem:[%s1984_s3] sm:$0xff]  ;;  %s1669_s26 = smov 104   ;;  %s1670_s29 = smov 8  }
   0x8   :  { %146 = vmatpush1.msra.mxu1 %v25_v20  ;;  %v94_v34 = vrot.slane %v1747_v32, %v1742_v31  ;;  %v100_v37 = vrot.slane %v1747_v32, %v99_v33  ;;  %v106_v45 = vrot.slane %v31_v44, %v1742_v31  ;;  %v206_v59 = vld [vmem:[%s1982_s1] sm:$0xff]  ;;  %v41_v20 = vld [vmem:[%s1985_s4 + $0x8] sm:$0xff]  ;;  %s1671_s19 = smov 16  }
   0x9   :  { %147 = vmatprep.subr.mxu1 %v24_v21 }
   0xa   :  { %148 = vmatpush1.msra.mxu1 %v23_v22 }
  0x8c   :  { %v66_v4 = vpop.xlane.xlu0 %65 }
  0x8d   :  { %v71_v5 = vmul.f32 0.03125, %v66_v4 }
  0x8f   :  { %v73_v6 = vsub.f32 %v21_v0, %v71_v5 }
  0x90   :  { %v69_v7 = vpop.xlane.xlu0 %68 }
  0x91   :  { %v72_v8 = vmul.f32 0.03125, %v69_v7  ;;  %v75_v9 = vmul.f32 %v73_v6, %v73_v6 }
  0x93   :  { %v74_v10 = vsub.f32 %v22_v1, %v72_v8  ;;  %v77_v11 = vsel %vm63_vm0, %v75_v9, 0.0 }
  0x94   :  { %78 = vadd.xlane.f32.xlu1 %v77_v11 }
  0x95   :  { %v76_v12 = vmul.f32 %v74_v10, %v74_v10 }
  0x97   :  { %v80_v13 = vsel %vm63_vm0, %v76_v12, 0.0 }
  0x98   :  { %81 = vadd.xlane.f32.xlu1 %v80_v13 }
 0x11d   :  { %v79_v23 = vpop.xlane.xlu1 %78 }
 0x11e   :  { %v83_v24 = vmul.f32 0.03125, %v79_v23 }
 0x120   :  { %v85_v25 = vadd.f32 1e-12, %v83_v24 }
 0x121   :  { %v82_v26 = vpop.xlane.xlu1 %81 }
 0x122   :  { %1595 = vrsqrt.f32 %v85_v25  ;;  %v84_v27 = vmul.f32 0.03125, %v82_v26 }
 0x124   :  { %v86_v29 = vadd.f32 1e-12, %v84_v27 }
 0x126   :  { %1597 = vrsqrt.f32 %v86_v29 }
 0x12f   :  { %v1596_v35 = vpop.eup %1595 }
 0x130   :  { %v89_v36 = vmul.f32 %v1596_v35, %v73_v6  ;;  %v32_v6 = vld [vmem:[%s1983_s2 + $0x48] sm:$0xff] }
 0x132   :  { %v95_v38 = vmul.f32 %v94_v34, %v89_v36 }
 0x133   :  { %v1598_v39 = vpop.eup %1597 }
 0x134   :  { %v1753_v40 = vadd.f32 %v100_v37, %v95_v38  ;;  %v90_v41 = vmul.f32 %v1598_v39, %v74_v10  ;;  %v110_v10 = vrot.slane %v32_v6, %v1742_v31 }
 0x136   :  { %1376 = vmatmul.mubr.msk.f32.vlgmr.msra.gmra.mxu1 %vm63_vm0, %v1753_v40  ;;  %v96_v42 = vmul.f32 %v94_v34, %v90_v41 }
 0x137   :  { %187 = vmatprep.mubr.f32.mxu1 %v1661_v18  ;;  %v42_v18 = vld [vmem:[%s1985_s4 + $0x10] sm:$0xff] }
 0x138   :  { %v1757_v43 = vadd.f32 %v100_v37, %v96_v42 }
 0x13a   :  { %1377 = vmatmul.mubr.msk.f32.gmra.mxu1 %vm63_vm0, %v1757_v43 }
 0x1f6   :  { %v183_v47 = vpop.f32.mrf.mxu1 }
 0x1f7   :  { %v184_v48 = vadd.f32 %v183_v47, %v106_v45 }
 0x1f8   :  { %v1768_v49 = vpop.f32.mrf.mxu1 }
 0x1f9   :  { %v194_v50 = vmul.f32 %v184_v48, %v33_v46  ;;  %v1813_v14 = vadd.f32 %v1768_v49, %v110_v10 }
 0x1fa   :  { %v189_v52 = vpop.f32.mrf.mxu1 }
 0x1fb   :  { %v190_v53 = vadd.f32 %v189_v52, %v106_v45  ;;  %198 = vrot.lane.b32.xlu1 %v194_v50, %s1662_s20 }
 0x1fc   :  { %v191_v9 = vpop.f32.mrf.mxu1 }
 0x1fd   :  { %v195_v54 = vmul.f32 %v190_v53, %v34_v51  ;;  %v192_v12 = vadd.f32 %v191_v9, %v110_v10 }
 0x1ff   :  { %200 = vrot.lane.b32.xlu0 %v195_v54, %s1662_s20  ;;  %s1672_s20 = smov 24  }
 0x26d   :  { %v199_v55 = vpop.permute.xlu1 %198 }
 0x26e   :  { %v204_v56 = vadd.f32 %v199_v55, %v194_v50 }
 0x270   :  { %310 = vrot.lane.b32.xlu0 %v204_v56, %s1663_s21  ;;  %1472 = vmatprep.mubr.msk.f32.mxu1 %vm216_vm1, %v204_v56 }
 0x271   :  { %v201_v57 = vpop.permute.xlu0 %200 }
 0x272   :  { %v205_v58 = vadd.f32 %v201_v57, %v195_v54 }
 0x274   :  { %225 = vrot.lane.b32.xlu1 %v205_v58, %s1664_s0  ;;  %316 = vrot.lane.b32.xlu0 %v205_v58, %s1665_s22 }
 0x278   :  { %405 = vrot.lane.b32.xlu0 %v204_v56, %s1666_s23  ;;  %223 = vrot.lane.b32.xlu1 %v204_v56, %s1664_s0 }
 0x27c   :  { %312 = vrot.lane.b32.xlu0 %v205_v58, %s1663_s21  ;;  %314 = vrot.lane.b32.xlu1 %v204_v56, %s1665_s22 }
 0x280   :  { %401 = vrot.lane.b32.xlu0 %v204_v56, %s1667_s24  ;;  %496 = vrot.lane.b32.xlu1 %v204_v56, %s1668_s25 }
 0x284   :  { %492 = vrot.lane.b32.xlu0 %v204_v56, %s1669_s26  ;;  %407 = vrot.lane.b32.xlu1 %v205_v58, %s1666_s23 }
 0x288   :  { %498 = vrot.lane.b32.xlu1 %v205_v58, %s1668_s25  ;;  %210 = vrot.lane.b32.xlu0 %v206_v59, %s1670_s29 }
 0x28c   :  { %403 = vrot.lane.b32.xlu1 %v205_v58, %s1667_s24 }
 0x290   :  { %494 = vrot.lane.b32.xlu1 %v205_v58, %s1669_s26 }
 0x294   :  { %212 = vrot.lane.b32.xlu1 %v207_v60, %s1670_s29 }
 0x2e2   :  { %v311_v61 = vpop.permute.xlu0 %310 }
 0x2e6   :  { %v317_v62 = vpop.permute.xlu0 %316  ;;  %v226_v63 = vpop.permute.xlu1 %225 }
 0x2e7   :  { %1468 = vmatprep.subr.msk.mxu1 %vm216_vm1, %v226_v63 }
 0x2e8   :  { %1469 = vmatpush3.xpose.msk.msra.mxu1 %vm216_vm1, %v226_v63 }
 0x2ea   :  { %v406_v0 = vpop.permute.xlu0 %405  ;;  %v224_v1 = vpop.permute.xlu1 %223 }
 0x2eb   :  { %1470 = vmatprep.subr.msk.mxu1 %vm216_vm1, %v224_v1 }
 0x2ec   :  { %1471 = vmatpush3.xpose.msk.msra.mxu1 %vm216_vm1, %v224_v1 }
 0x2ed   :  { %1475 = vmatprep.subr.msk.mxu1 %vm216_vm1, %v317_v62 }
 0x2ee   :  { %v313_v2 = vpop.permute.xlu0 %312  ;;  %v315_v3 = vpop.permute.xlu1 %314 }
 0x2ef   :  { %1473 = vmatmul.mubr.msk.f32.vlgmr.msra.gmra.mxu1 %vm216_vm1, %v205_v58 }
 0x2f0   :  { %1476 = vmatpush3.xpose.msk.msra.mxu1 %vm216_vm1, %v317_v62  ;;  %1479 = vmatprep.mubr.msk.f32.mxu1 %vm216_vm1, %v311_v61 }
 0x2f1   :  { %1477 = vmatprep.subr.msk.mxu1 %vm216_vm1, %v315_v3 }
 0x2f2   :  { %v402_v4 = vpop.permute.xlu0 %401  ;;  %v497_v5 = vpop.permute.xlu1 %496 }
 0x2f4   :  { %1478 = vmatpush3.xpose.msk.msra.mxu1 %vm216_vm1, %v315_v3 }
 0x2f6   :  { %v493_v7 = vpop.permute.xlu0 %492  ;;  %v408_v8 = vpop.permute.xlu1 %407 }
 0x2f7   :  { %1480 = vmatmul.mubr.msk.f32.vlgmr.msra.gmra.mxu1 %vm216_vm1, %v313_v2  ;;  %1482 = vmatprep.subr.msk.mxu1 %vm216_vm1, %v408_v8 }
 0x2f8   :  { %1493 = vmatprep.mubr.msk.f32.mxu0 %vm216_vm1, %v493_v7  ;;  %1483 = vmatpush3.xpose.msk.msra.mxu1 %vm216_vm1, %v408_v8 }
 0x2f9   :  { %1486 = vmatprep.mubr.msk.f32.mxu1 %vm216_vm1, %v402_v4  ;;  %1484 = vmatprep.subr.msk.mxu1 %vm216_vm1, %v406_v0 }
 0x2fa   :  { %v499_v11 = vpop.permute.xlu1 %498  ;;  %v211_v17 = vpop.permute.xlu0 %210 }
 0x2fb   :  { %1489 = vmatprep.subr.msk.mxu0 %vm216_vm1, %v499_v11  ;;  %v217_v21 = vsel %vm216_vm1, %v206_v59, %v211_v17 }
 0x2fc   :  { %1485 = vmatpush3.xpose.msk.msra.mxu1 %vm216_vm1, %v406_v0  ;;  %1490 = vmatpush3.xpose.msk.msra.mxu0 %vm216_vm1, %v499_v11  ;;  %v219_v23 = vadd.f32 %v217_v21, %v41_v20 }
 0x2fd   :  { %1491 = vmatprep.subr.msk.mxu0 %vm216_vm1, %v497_v5  ;;  %1496 = vmatprep.subr.mxu1 %v192_v12 }
 0x2fe   :  { %v404_v13 = vpop.permute.xlu1 %403 }
 0x2ff   :  { %1487 = vmatmul.mubr.msk.f32.vlgmr.msra.gmra.mxu1 %vm216_vm1, %v404_v13 }
 0x300   :  { %1492 = vmatpush3.xpose.msk.msra.mxu0 %vm216_vm1, %v497_v5  ;;  %1497 = vmatpush3.msra.mxu1 %v192_v12 }
 0x301   :  { %1498 = vmatprep.subr.mxu1 %v1813_v14 }
 0x302   :  { %1499 = vmatpush3.msra.mxu1 %v1813_v14  ;;  %v495_v15 = vpop.permute.xlu1 %494 }
 0x303   :  { %1494 = vmatmul.mubr.msk.f32.vlgmr.msra.gmra.mxu0 %vm216_vm1, %v495_v15 }
 0x306   :  { %v213_v16 = vpop.permute.xlu1 %212 }
 0x307   :  { %v218_v19 = vsel %vm216_vm1, %v207_v60, %v213_v16 }
 0x308   :  { %v220_v22 = vadd.f32 %v218_v19, %v42_v18 }
 0x3af   :  { %v1474_v24 = vpop.f32.mrf.mxu1 }
 0x3b0   :  { %v307_v25 = vadd.f32 %v1474_v24, %v220_v22 }
 0x3b1   :  { %v301_v26 = vpop.f32.mrf.mxu1 }
 0x3b2   :  { %v302_v27 = vadd.f32 %v301_v26, %v219_v23  ;;  %v587_v28 = vsel %vm583_vm2, %v307_v25, -inf }
 0x3b3   :  { %588 = vmax.xlane.f32.xlu1 %v587_v28 }
 0x3b4   :  { %v584_v29 = vsel %vm583_vm2, %v302_v27, -inf }
 0x3b5   :  { %585 = vmax.xlane.f32.xlu0 %v584_v29 }
 0x3b7   :  { %v1481_v33 = vpop.f32.mrf.mxu1 }
 0x3b8   :  { %v398_v34 = vadd.f32 %v1481_v33, %v220_v22 }
 0x3b9   :  { %v392_v35 = vpop.f32.mrf.mxu1 }
 0x3ba   :  { %v393_v36 = vadd.f32 %v392_v35, %v219_v23  ;;  %v593_v37 = vsel %vm583_vm2, %v398_v34, -inf }
 0x3bb   :  { %594 = vmax.xlane.f32.xlu0 %v593_v37 }
 0x3bc   :  { %v590_v38 = vsel %vm583_vm2, %v393_v36, -inf }
 0x3bf   :  { %v1488_v39 = vpop.f32.mrf.mxu1  ;;  %591 = vmax.xlane.f32.xlu0 %v590_v38 }
 0x3c0   :  { %v489_v41 = vadd.f32 %v1488_v39, %v220_v22 }
 0x3c1   :  { %v483_v42 = vpop.f32.mrf.mxu1 }
 0x3c2   :  { %v484_v44 = vadd.f32 %v483_v42, %v219_v23  ;;  %v599_v45 = vsel %vm583_vm2, %v489_v41, -inf }
 0x3c3   :  { %v1495_v46 = vpop.f32.mrf.mxu0  ;;  %600 = vmax.xlane.f32.xlu1 %v599_v45 }
 0x3c4   :  { %v580_v47 = vadd.f32 %v1495_v46, %v220_v22  ;;  %v596_v48 = vsel %vm583_vm2, %v484_v44, -inf }
 0x3c5   :  { %v574_v49 = vpop.f32.mrf.mxu0  ;;  %597 = vmax.xlane.f32.xlu0 %v596_v48 }
 0x3c6   :  { %v575_v50 = vadd.f32 %v574_v49, %v219_v23  ;;  %v605_v51 = vsel %vm583_vm2, %v580_v47, -inf }
 0x3c7   :  { %606 = vmax.xlane.f32.xlu1 %v605_v51 }
 0x3c8   :  { %v602_v52 = vsel %vm583_vm2, %v575_v50, -inf }
 0x3c9   :  { %603 = vmax.xlane.f32.xlu0 %v602_v52 }
 0x3d8   :  { %755 = vrot.lane.b32.xlu1 %v1813_v14, %s1663_s21 }
 0x3dc   :  { %844 = vrot.lane.b32.xlu1 %v192_v12, %s1667_s24 }
 0x3df   :  { %757 = vrot.lane.b32.xlu0 %v192_v12, %s1663_s21 }
 0x3e0   :  { %931 = vrot.lane.b32.xlu1 %v192_v12, %s1669_s26 }
 0x43c   :  { %v589_v53 = vpop.xlane.xlu1 %588 }
 0x43d   :  { %v609_v54 = vsub.f32 %v307_v25, %v589_v53 }
 0x43e   :  { %v586_v55 = vpop.xlane.xlu0 %585 }
 0x43f   :  { %v618_v56 = vmul.f32 1.442695, %v609_v54  ;;  %v608_v57 = vsub.f32 %v302_v27, %v586_v55 }
 0x441   :  { %1599 = vpow2.f32 %v618_v56  ;;  %v616_v58 = vmul.f32 1.442695, %v608_v57 }
 0x443   :  { %1601 = vpow2.f32 %v616_v58 }
 0x444   :  { %v595_v59 = vpop.xlane.xlu0 %594 }
 0x445   :  { %v611_v63 = vsub.f32 %v398_v34, %v595_v59 }
 0x447   :  { %v622_v7 = vmul.f32 1.442695, %v611_v63 }
 0x448   :  { %v592_v60 = vpop.xlane.xlu0 %591 }
 0x449   :  { %v610_v4 = vsub.f32 %v393_v36, %v592_v60 }
 0x44b   :  { %v620_v13 = vmul.f32 1.442695, %v610_v4 }
 0x44c   :  { %v601_v61 = vpop.xlane.xlu1 %600 }
 0x44d   :  { %v613_v9 = vsub.f32 %v489_v41, %v601_v61 }
 0x44e   :  { %v1600_v62 = vpop.eup %1599  ;;  %v598_v0 = vpop.xlane.xlu0 %597 }
 0x44f   :  { %v635_v1 = vsel %vm583_vm2, %v1600_v62, 0.0  ;;  %v612_v15 = vsub.f32 %v484_v44, %v598_v0  ;;  %v626_v18 = vmul.f32 1.442695, %v613_v9  ;;  %v46_v0 = vld [vmem:[%s1985_s4 + $0x30] sm:$0xff] }
 0x450   :  { %v1602_v2 = vpop.eup %1601  ;;  %636 = vadd.xlane.f32.xlu1 %v635_v1  ;;  %v607_v3 = vpop.xlane.xlu1 %606 }
 0x451   :  { %v615_v5 = vsub.f32 %v580_v47, %v607_v3  ;;  %v632_v6 = vsel %vm583_vm2, %v1602_v2, 0.0  ;;  %v624_v20 = vmul.f32 1.442695, %v612_v15  ;;  %v44_v3 = vld [vmem:[%s1985_s4 + $0x20] sm:$0xff] }
 0x452   :  { %633 = vadd.xlane.f32.xlu0 %v632_v6  ;;  %v604_v8 = vpop.xlane.xlu0 %603 }
 0x453   :  { %v630_v10 = vmul.f32 1.442695, %v615_v5  ;;  %v614_v11 = vsub.f32 %v575_v50, %v604_v8  ;;  %v43_v5 = vld [vmem:[%s1985_s4 + $0x18] sm:$0xff] }
 0x454   :  { %v756_v12 = vpop.permute.xlu1 %755 }
 0x455   :  { %1603 = vpow2.f32 %v630_v10  ;;  %v628_v16 = vmul.f32 1.442695, %v614_v11 }
 0x456   :  { %1605 = vpow2.f32 %v622_v7  ;;  %v758_v17 = vpop.permute.xlu0 %757 }
 0x457   :  { %1607 = vpow2.f32 %v628_v16  ;;  %1503 = vmatprep.subr.mxu1 %v758_v17 }
 0x458   :  { %v845_v19 = vpop.permute.xlu1 %844  ;;  %1609 = vpow2.f32 %v620_v13 }
 0x459   :  { %1510 = vmatprep.subr.mxu0 %v845_v19  ;;  %1611 = vpow2.f32 %v626_v18 }
 0x45a   :  { %1511 = vmatpush3.msra.mxu0 %v845_v19  ;;  %1613 = vpow2.f32 %v624_v20 }
 0x45c   :  { %v932_v36 = vpop.permute.xlu1 %931 }
 0x462   :  { %v1843_v21 = vpop.eup %1603 }
 0x463   :  { %v1606_v22 = vpop.eup %1605  ;;  %v653_v23 = vsel %vm583_vm2, %v1843_v21, 0.0 }
 0x464   :  { %v1608_v24 = vpop.eup %1607  ;;  %654 = vadd.xlane.f32.xlu1 %v653_v23  ;;  %v641_v27 = vsel %vm583_vm2, %v1606_v22, 0.0 }
 0x465   :  { %v650_v25 = vsel %vm583_vm2, %v1608_v24, 0.0  ;;  %v1610_v26 = vpop.eup %1609 }
 0x466   :  { %651 = vadd.xlane.f32.xlu0 %v650_v25  ;;  %v1612_v28 = vpop.eup %1611  ;;  %v638_v29 = vsel %vm583_vm2, %v1610_v26, 0.0  ;;  %v1049_v25 = vsub.s32 2, %v1739_v30 }
 0x467   :  { %v1614_v33 = vpop.eup %1613  ;;  %v647_v34 = vsel %vm583_vm2, %v1612_v28, 0.0 }
 0x468   :  { %642 = vadd.xlane.f32.xlu1 %v641_v27  ;;  %v644_v35 = vsel %vm583_vm2, %v1614_v33, 0.0 }
 0x46a   :  { %639 = vadd.xlane.f32.xlu0 %v638_v29 }
 0x46c   :  { %648 = vadd.xlane.f32.xlu1 %v647_v34 }
 0x46e   :  { %645 = vadd.xlane.f32.xlu0 %v644_v35 }
 0x47d   :  { %929 = vrot.lane.b32.xlu1 %v1813_v14, %s1669_s26 }
 0x484   :  { %842 = vrot.lane.b32.xlu0 %v1813_v14, %s1667_s24 }
 0x4d9   :  { %v637_v37 = vpop.xlane.xlu1 %636 }
 0x4da   :  { %1615 = vrcp.f32 %v637_v37 }
 0x4db   :  { %v634_v38 = vpop.xlane.xlu0 %633 }
 0x4dc   :  { %1617 = vrcp.f32 %v634_v38 }
 0x4e7   :  { %v1616_v39 = vpop.eup %1615 }
 0x4e8   :  { %v659_v44 = vmul.f32 %v1616_v39, %v1600_v62 }
 0x4e9   :  { %v1618_v41 = vpop.eup %1617 }
 0x4ea   :  { %v657_v42 = vmul.f32 %v1618_v41, %v1602_v2  ;;  %v45_v2 = vld [vmem:[%s1985_s4 + $0x28] sm:$0xff] }
 0x4ec   :  { %1500 = vmatprep.mubr.msk.f32.mxu1 %vm583_vm2, %v657_v42 }
 0x4ed   :  { %1501 = vmatmul.mubr.msk.f32.vlgmr.msra.gmra.mxu1 %vm583_vm2, %v659_v44  ;;  %v655_v45 = vpop.xlane.xlu1 %654 }
 0x4ee   :  { %1504 = vmatpush3.msra.mxu1 %v758_v17 }
 0x4ef   :  { %1505 = vmatprep.subr.mxu1 %v756_v12  ;;  %v652_v46 = vpop.xlane.xlu0 %651 }
 0x4f0   :  { %1506 = vmatpush3.msra.mxu1 %v756_v12  ;;  %1619 = vrcp.f32 %v652_v46 }
 0x4f1   :  { %1517 = vmatprep.subr.mxu1 %v932_v36  ;;  %v643_v14 = vpop.xlane.xlu1 %642 }
 0x4f2   :  { %1621 = vrcp.f32 %v643_v14 }
 0x4f3   :  { %v640_v47 = vpop.xlane.xlu0 %639 }
 0x4f4   :  { %1623 = vrcp.f32 %v640_v47  ;;  %v38_v47 = vld [vmem:[%s1984_s3 + $0x28] sm:$0xff] }
 0x4f5   :  { %v649_v48 = vpop.xlane.xlu1 %648  ;;  %1625 = vrcp.f32 %v655_v45 }
 0x4f6   :  { %1627 = vrcp.f32 %v649_v48  ;;  %v37_v48 = vld [vmem:[%s1984_s3 + $0x20] sm:$0xff] }
 0x4f7   :  { %v646_v49 = vpop.xlane.xlu0 %645 }
 0x4f8   :  { %1629 = vrcp.f32 %v646_v49  ;;  %v36_v49 = vld [vmem:[%s1984_s3 + $0x18] sm:$0xff] }
 0x4f9   :  { %v930_v60 = vpop.permute.xlu1 %929 }
 0x4fb   :  { %v843_v50 = vpop.permute.xlu0 %842 }
 0x4fc   :  { %1512 = vmatprep.subr.mxu0 %v843_v50 }
 0x4fd   :  { %1513 = vmatpush3.msra.mxu0 %v843_v50  ;;  %v1620_v51 = vpop.eup %1619  ;;  %v35_v50 = vld [vmem:[%s1984_s3 + $0x10] sm:$0xff] }
 0x4fe   :  { %v669_v58 = vmul.f32 %v1620_v51, %v1608_v24  ;;  %1524 = vmatprep.subr.mxu0 %v46_v0 }
 0x4ff   :  { %v1622_v52 = vpop.eup %1621 }
 0x500   :  { %v663_v56 = vmul.f32 %v1622_v52, %v1606_v22 }
 0x501   :  { %v1624_v53 = vpop.eup %1623 }
 0x502   :  { %v661_v54 = vmul.f32 %v1624_v53, %v1610_v26  ;;  %v1626_v55 = vpop.eup %1625  ;;  %v1050_v26 = vrot.slane %v1747_v32, %v1049_v25 }
 0x503   :  { %v1628_v57 = vpop.eup %1627  ;;  %v671_v63 = vmul.f32 %v1626_v55, %v1843_v21 }
 0x504   :  { %1507 = vmatprep.mubr.msk.f32.mxu1 %vm583_vm2, %v661_v54  ;;  %v667_v62 = vmul.f32 %v1628_v57, %v1612_v28  ;;  %v1052_v27 = vadd.f32 %v1050_v26, %v1757_v43  ;;  %v1164_v57 = vsub.s32 3, %v1739_v30 }
 0x505   :  { %v1630_v59 = vpop.eup %1629  ;;  %1508 = vmatmul.mubr.msk.f32.vlgmr.msra.gmra.mxu1 %vm583_vm2, %v663_v56 }
 0x506   :  { %1518 = vmatpush3.msra.mxu1 %v932_v36  ;;  %1521 = vmatprep.mubr.msk.f32.mxu1 %vm583_vm2, %v669_v58  ;;  %v665_v61 = vmul.f32 %v1630_v59, %v1614_v33  ;;  %v1051_v33 = vadd.f32 %v1050_v26, %v1753_v40  ;;  %v1170_v58 = vsub.s32 4, %v1739_v30  ;;  %v1165_v59 = vrot.slane %v1747_v32, %v1164_v57 }
 0x507   :  { %1519 = vmatprep.subr.mxu1 %v930_v60 }
 0x508   :  { %1520 = vmatpush3.msra.mxu1 %v930_v60  ;;  %1514 = vmatprep.mubr.msk.f32.mxu0 %vm583_vm2, %v665_v61 }
 0x509   :  { %1515 = vmatmul.mubr.msk.f32.vlgmr.msra.gmra.mxu0 %vm583_vm2, %v667_v62  ;;  %1522 = vmatmul.mubr.msk.f32.vlgmr.msra.gmra.mxu1 %vm583_vm2, %v671_v63  ;;  %v1171_v62 = vrot.slane %v1747_v32, %v1170_v58 }
 0x50a   :  { %1525 = vmatpush3.msra.mxu0 %v46_v0  ;;  %1535 = vmatprep.subr.mxu1 %v38_v47 }
 0x50b   :  { %1526 = vmatprep.subr.mxu0 %v45_v2  ;;  %1536 = vmatpush3.msra.mxu1 %v38_v47 }
 0x50c   :  { %1527 = vmatpush3.msra.mxu0 %v45_v2  ;;  %1537 = vmatprep.subr.mxu1 %v37_v48 }
 0x50d   :  { %1528 = vmatprep.subr.mxu0 %v44_v3  ;;  %1538 = vmatpush3.msra.mxu1 %v37_v48 }
 0x50e   :  { %1529 = vmatpush3.msra.mxu0 %v44_v3  ;;  %1539 = vmatprep.subr.mxu1 %v36_v49 }
 0x50f   :  { %1530 = vmatprep.subr.mxu0 %v43_v5  ;;  %1540 = vmatpush3.msra.mxu1 %v36_v49  ;;  %v1279_v49 = vsub.s32 5, %v1739_v30 }
 0x510   :  { %1531 = vmatpush3.msra.mxu0 %v43_v5  ;;  %1541 = vmatprep.subr.mxu1 %v35_v50  ;;  %v62_v5 = vld [vmem:[%s1985_s4 + $0xb0] sm:$0xff] }
 0x511   :  { %1542 = vmatpush3.msra.mxu1 %v35_v50  ;;  %1546 = vmatprep.subr.mxu0 %v62_v5  ;;  %v1280_v50 = vrot.slane %v1747_v32, %v1279_v49 }
 0x5ad   :  { %v1502_v1 = vpop.f32.mrf.mxu1 }
 0x5af   :  { %v744_v4 = vpop.f32.mrf.mxu1 }
 0x5c5   :  { %v1509_v6 = vpop.f32.mrf.mxu1 }
 0x5c6   :  { %1020 = vrot.lane.b32.xlu1 %v1509_v6, %s1670_s29  ;;  %v61_v6 = vld [vmem:[%s1985_s4 + $0xa8] sm:$0xff] }
 0x5c7   :  { %v833_v7 = vpop.f32.mrf.mxu1 }
 0x5c8   :  { %1018 = vrot.lane.b32.xlu0 %v833_v7, %s1670_s29  ;;  %v60_v7 = vld [vmem:[%s1985_s4 + $0xa0] sm:$0xff] }
 0x5c9   :  { %v1516_v8 = vpop.f32.mrf.mxu0  ;;  %v1523_v9 = vpop.f32.mrf.mxu1 }
 0x5ca   :  { %1028 = vrot.lane.b32.xlu1 %v1516_v8, %s1671_s19  ;;  %v59_v8 = vld [vmem:[%s1985_s4 + $0x98] sm:$0xff] }
 0x5cb   :  { %v920_v10 = vpop.f32.mrf.mxu0  ;;  %v1007_v11 = vpop.f32.mrf.mxu1 }
 0x5cc   :  { %1026 = vrot.lane.b32.xlu0 %v920_v10, %s1671_s19  ;;  %v57_v10 = vld [vmem:[%s1985_s4 + $0x88] sm:$0xff] }
 0x5ce   :  { %1036 = vrot.lane.b32.xlu1 %v1523_v9, %s1672_s20  ;;  %v58_v9 = vld [vmem:[%s1985_s4 + $0x90] sm:$0xff] }
 0x5d0   :  { %1034 = vrot.lane.b32.xlu0 %v1007_v11, %s1672_s20  ;;  %v56_v11 = vld [vmem:[%s1985_s4 + $0x80] sm:$0xff] }
 0x638   :  { %v1021_v12 = vpop.permute.xlu1 %1020 }
 0x639   :  { %v1041_v19 = vsel %vm216_vm1, %v1502_v1, %v1021_v12  ;;  %v55_v12 = vld [vmem:[%s1985_s4 + $0x78] sm:$0xff] }
 0x63a   :  { %v1019_v13 = vpop.permute.xlu0 %1018 }
 0x63b   :  { %v1040_v17 = vsel %vm216_vm1, %v744_v4, %v1019_v13  ;;  %v54_v13 = vld [vmem:[%s1985_s4 + $0x70] sm:$0xff] }
 0x63c   :  { %v1029_v15 = vpop.permute.xlu1 %1028 }
 0x63d   :  { %v1043_v22 = vsel %vm583_vm2, %v1041_v19, %v1029_v15  ;;  %v53_v15 = vld [vmem:[%s1985_s4 + $0x68] sm:$0xff] }
 0x63e   :  { %v1027_v16 = vpop.permute.xlu0 %1026  ;;  %v49_v19 = vld [vmem:[%s1985_s4 + $0x48] sm:$0xff] }
 0x63f   :  { %v1042_v20 = vsel %vm583_vm2, %v1040_v17, %v1027_v16  ;;  %v52_v16 = vld [vmem:[%s1985_s4 + $0x60] sm:$0xff]  ;;  %v51_v17 = vld [vmem:[%s1985_s4 + $0x58] sm:$0xff] }
 0x640   :  { %v1037_v18 = vpop.permute.xlu1 %1036 }
 0x641   :  { %v1046_v24 = vsel %vm1044_vm3, %v1043_v22, %v1037_v18  ;;  %v50_v18 = vld [vmem:[%s1985_s4 + $0x50] sm:$0xff] }
 0x642   :  { %v1035_v21 = vpop.permute.xlu0 %1034  ;;  %v39_v22 = vld [vmem:[%s1984_s3 + $0x30] sm:$0xff]  ;;  %s1673_s3 = smov [#allocation2]  }
 0x643   :  { %v1045_v23 = vsel %vm1044_vm3, %v1042_v20, %v1035_v21  ;;  %v48_v20 = vld [vmem:[%s1985_s4 + $0x40] sm:$0xff]  ;;  %v47_v21 = vld [vmem:[%s1985_s4 + $0x38] sm:$0xff]  ;;  %s1365_s4 = sshll.u32 %s1673_s3, 4  ;;  %s1366_s4 = int_to_ptr.vmem [resolvable:$true] %s1365_s4 }
 0x644   :  { %1532 = vmatprep.mubr.msk.f32.mxu0 %vm63_vm0, %v1045_v23  ;;  %v1177_v23 = vrot.slane %v39_v22, %v1742_v31  ;;  %s1639_s9 = scalar_lea.vmem %s1366_s4, 256  ;;  %p1644_p1 = scmp.lt.s32.totalorder %s1366_s4, %s1366_s4 }
 0x645   :  { %1533 = vmatmul.mubr.msk.f32.vlgmr.msra.gmra.mxu0 %vm63_vm0, %v1046_v24  ;;  %p1640_p0 = scmp.ne.s32.totalorder %s1366_s4, %s1639_s9  ;;  %p1645_p2 = scmp.lt.s32.totalorder %s1639_s9, %s1639_s9 }
 0x646   :  { %1547 = vmatpush3.msra.mxu0 %v62_v5 }
 0x647   :  { %1548 = vmatprep.subr.mxu0 %v61_v6  ;;  %p1646_p3 = por %p1645_p2, %p1644_p1 }
 0x648   :  { %1549 = vmatpush3.msra.mxu0 %v61_v6 }
 0x649   :  { %1550 = vmatprep.subr.mxu0 %v60_v7  ;;  %p1647_p4 = pnand %p1646_p3, %p1640_p0 }
 0x64a   :  { %1551 = vmatpush3.msra.mxu0 %v60_v7 }
 0x64b   :  { %1552 = vmatprep.subr.mxu0 %v59_v8 }
 0x64c   :  { %1553 = vmatpush3.msra.mxu0 %v59_v8 }
 0x64d   :  { %1554 = vmatprep.subr.mxu0 %v58_v9 }
 0x64e   :  { %1555 = vmatpush3.msra.mxu0 %v58_v9 }
 0x64f   :  { %1556 = vmatprep.subr.mxu0 %v57_v10 }
 0x650   :  { %1557 = vmatpush3.msra.mxu0 %v57_v10 }
 0x651   :  { %1558 = vmatprep.subr.mxu0 %v56_v11 }
 0x652   :  { %1559 = vmatpush3.msra.mxu0 %v56_v11 }
 0x653   :  { %1560 = vmatprep.subr.mxu0 %v55_v12 }
 0x654   :  { %1561 = vmatpush3.msra.mxu0 %v55_v12 }
 0x655   :  { %1562 = vmatprep.subr.mxu0 %v54_v13 }
 0x656   :  { %1563 = vmatpush3.msra.mxu0 %v54_v13 }
 0x657   :  { %1564 = vmatprep.subr.mxu0 %v53_v15 }
 0x658   :  { %1565 = vmatpush3.msra.mxu0 %v53_v15 }
 0x659   :  { %1566 = vmatprep.subr.mxu0 %v52_v16 }
 0x65a   :  { %1567 = vmatpush3.msra.mxu0 %v52_v16 }
 0x65b   :  { %1568 = vmatprep.subr.mxu0 %v51_v17 }
 0x65c   :  { %1569 = vmatpush3.msra.mxu0 %v51_v17 }
 0x65d   :  { %1570 = vmatprep.subr.mxu0 %v50_v18 }
 0x65e   :  { %1571 = vmatpush3.msra.mxu0 %v50_v18 }
 0x65f   :  { %1572 = vmatprep.subr.mxu0 %v49_v19 }
 0x660   :  { %1573 = vmatpush3.msra.mxu0 %v49_v19 }
 0x661   :  { %1574 = vmatprep.subr.mxu0 %v48_v20 }
 0x662   :  { %1575 = vmatpush3.msra.mxu0 %v48_v20 }
 0x663   :  { %1576 = vmatprep.subr.mxu0 %v47_v21 }
 0x664   :  { %1577 = vmatpush3.msra.mxu0 %v47_v21 }
 0x705   :  { %v1534_v28 = vpop.f32.mrf.mxu0 }
 0x706   :  { %v1888_v29 = vadd.f32 %v1534_v28, %v1052_v27 }
 0x707   :  { %v1125_v34 = vpop.f32.mrf.mxu0 }
 0x708   :  { %v1891_v35 = vadd.f32 %v1125_v34, %v1051_v33  ;;  %v1139_v36 = vsel %vm63_vm0, %v1888_v29, 0.0 }
 0x709   :  { %1140 = vadd.xlane.f32.xlu1 %v1139_v36 }
 0x70a   :  { %v1136_v37 = vsel %vm63_vm0, %v1891_v35, 0.0 }
 0x70b   :  { %1137 = vadd.xlane.f32.xlu0 %v1136_v37 }
 0x792   :  { %v1141_v38 = vpop.xlane.xlu1 %1140 }
 0x793   :  { %v1143_v39 = vmul.f32 0.03125, %v1141_v38 }
 0x794   :  { %v1138_v41 = vpop.xlane.xlu0 %1137 }
 0x795   :  { %v1142_v43 = vmul.f32 0.03125, %v1138_v41  ;;  %v1145_v42 = vsub.f32 %v1888_v29, %v1143_v39 }
 0x797   :  { %v1144_v44 = vsub.f32 %v1891_v35, %v1142_v43  ;;  %v1147_v46 = vmul.f32 %v1145_v42, %v1145_v42 }
 0x799   :  { %v1146_v40 = vmul.f32 %v1144_v44, %v1144_v44  ;;  %v1151_v14 = vsel %vm63_vm0, %v1147_v46, 0.0 }
 0x79b   :  { %v1148_v45 = vsel %vm63_vm0, %v1146_v40, 0.0 }
 0x79c   :  { %1149 = vadd.xlane.f32.xlu0 %v1148_v45 }
 0x7a0   :  { %1152 = vadd.xlane.f32.xlu0 %v1151_v14 }
 0x825   :  { %v1150_v51 = vpop.xlane.xlu0 %1149 }
 0x826   :  { %v1154_v52 = vmul.f32 0.03125, %v1150_v51 }
 0x828   :  { %v1156_v53 = vadd.f32 1e-12, %v1154_v52 }
 0x829   :  { %v1153_v54 = vpop.xlane.xlu0 %1152 }
 0x82a   :  { %1631 = vrsqrt.f32 %v1156_v53  ;;  %v1155_v55 = vmul.f32 0.03125, %v1153_v54 }
 0x82c   :  { %v1157_v56 = vadd.f32 1e-12, %v1155_v55 }
 0x82e   :  { %1633 = vrsqrt.f32 %v1157_v56 }
 0x837   :  { %v1632_v60 = vpop.eup %1631 }
 0x838   :  { %v1160_v61 = vmul.f32 %v1632_v60, %v1144_v44 }
 0x83a   :  { %v1166_v63 = vmul.f32 %v1165_v59, %v1160_v61 }
 0x83b   :  { %v1634_v0 = vpop.eup %1633 }
 0x83c   :  { %v1161_v1 = vmul.f32 %v1634_v0, %v1145_v42  ;;  %v1172_v2 = vadd.f32 %v1171_v62, %v1166_v63 }
 0x83e   :  { %v1167_v3 = vmul.f32 %v1165_v59, %v1161_v1  ;;  %1543 = vmatprep.mubr.msk.f32.mxu1 %vm63_vm0, %v1172_v2 }
 0x840   :  { %v1173_v4 = vadd.f32 %v1171_v62, %v1167_v3 }
 0x842   :  { %1544 = vmatmul.mubr.msk.f32.vlgmr.msra.gmra.mxu1 %vm63_vm0, %v1173_v4 }
 0x902   :  { %v1545_v24 = vpop.f32.mrf.mxu1 }
 0x903   :  { %v1256_v25 = vadd.f32 %v1545_v24, %v1177_v23 }
 0x904   :  { %v1250_v26 = vpop.f32.mrf.mxu1 }
 0x905   :  { %v1262_v27 = vmul.f32 %v1256_v25, %v1256_v25  ;;  %v1251_v28 = vadd.f32 %v1250_v26, %v1177_v23  ;;  %v1260_v14 = vmul.f32 0.5, %v1256_v25 }
 0x907   :  { %v1264_v33 = vmul.f32 %v1262_v27, %v1256_v25  ;;  %v1261_v34 = vmul.f32 %v1251_v28, %v1251_v28  ;;  %v1259_v31 = vmul.f32 0.5, %v1251_v28 }
 0x909   :  { %v1266_v36 = vmul.f32 0.044715, %v1264_v33  ;;  %v1263_v37 = vmul.f32 %v1261_v34, %v1251_v28 }
 0x90b   :  { %v1268_v38 = vadd.f32 %v1266_v36, %v1256_v25  ;;  %v1265_v39 = vmul.f32 0.044715, %v1263_v37 }
 0x90d   :  { %v1270_v41 = vmul.f32 0.7978846, %v1268_v38  ;;  %v1267_v43 = vadd.f32 %v1265_v39, %v1251_v28 }
 0x90f   :  { %1635 = vtanh.f32 %v1270_v41  ;;  %v1269_v42 = vmul.f32 0.7978846, %v1267_v43 }
 0x911   :  { %1637 = vtanh.f32 %v1269_v42 }
 0x91c   :  { %v1636_v44 = vpop.eup %1635 }
 0x91d   :  { %v1274_v45 = vadd.f32 1.0, %v1636_v44 }
 0x91e   :  { %v1638_v40 = vpop.eup %1637 }
 0x91f   :  { %v1273_v46 = vadd.f32 1.0, %v1638_v40  ;;  %v1276_v48 = vmul.f32 %v1274_v45, %v1260_v14 }
 0x921   :  { %v1275_v47 = vmul.f32 %v1273_v46, %v1259_v31 }
 0x923   :  { %1578 = vmatprep.mubr.f32.mxu0 %v1275_v47 }
 0x924   :  { %1579 = vmatmul.mubr.f32.vlgmr.msra.gmra.mxu0 %v1276_v48 }
 0x9e4   :  { %v1580_v51 = vpop.f32.mrf.mxu0 }
 0x9e5   :  { %v1353_v52 = vadd.f32 %v1580_v51, %v1280_v50 }
 0x9e6   :  { %v1347_v53 = vpop.f32.mrf.mxu0 }
 0x9e7   :  { %v1357_v54 = vadd.f32 %v1353_v52, %v1888_v29  ;;  %v1348_v55 = vadd.f32 %v1347_v53, %v1280_v50 }
 0x9e9   :  { %1359 = vst.msk [vmem:[#allocation2 + $0x8] sm:$0xff] %vm63_vm0, %v1357_v54  ;;  %v1356_v56 = vadd.f32 %v1348_v55, %v1891_v35 }
 0x9eb   :  { %1358 = vst.msk [vmem:[#allocation2] sm:$0xff] %vm63_vm0, %v1356_v56 }
 0x9ec   :  { %1650 = shalt.err (!%p1647_p4)
}
 0x9ed   :  { %s1674_s10 = smov 128  }
 0x9ee   :  { %1371 = dma.vmem_to_hbm [thread:$0]  %s1366_s4, 256, %s1986_s5, [#allocation3], %s1674_s10, %s1674_s10, %s1670_s29  }
 0x9ef   :  { %1659 = dma.done.wait [#allocation3], 256  }
 0x9f0   :  { %1660 = vsyncadd [#allocation3], 4294967040 }
 0x9f1   :  { %1375 = vsyncpa [#allocation3], 1 }

</bundles_post_ra>
